<compile_context>
chip_gen: v6e
topology: v6e:2x2x1
jax: 0.10.0
libtpu: 0.0.40
codegen_flags: <defaults>
</compile_context>

<pallas_src>
import math

import jax
import jax.numpy as jnp
from jax.experimental import pallas as pl
from jax.experimental.pallas import tpu as pltpu

_TARGET_CHUNK_BYTES = 4 * 1024 * 1024  # aim for >= ~4 MiB per DMA descriptor
_MAX_CHUNKS = 8                        # 4-8 in-flight DMAs is plenty for HBM roofline


def _cdiv(a: int, b: int) -> int:
    return -(-a // b)


def _make_identity_dma_kernel(n_chunks: int, chunk_rows: int, leading: int):
    """Kernel factory: chunked HBM->HBM copy of the whole array.

    All chunk geometry is static Python (trace-time), so the kernel body is a
    flat sequence of DMA starts followed by the matching waits.
    """

    def kernel(x_hbm, o_hbm, sem):
        copies = []
        if n_chunks == 1:
            cp = pltpu.make_async_copy(x_hbm, o_hbm, sem.at[0])
            cp.start()
            copies.append(cp)
        else:
            for c in range(n_chunks):
                start = c * chunk_rows
                size = chunk_rows if c < n_chunks - 1 else leading - start
                cp = pltpu.make_async_copy(
                    x_hbm.at[pl.ds(start, size)],
                    o_hbm.at[pl.ds(start, size)],
                    sem.at[c],
                )
                cp.start()
                copies.append(cp)
        for cp in copies:
            cp.wait()

    return kernel


def _identity_copy_pallas(x: jax.Array) -> jax.Array:
    orig_shape = x.shape
    total = math.prod(orig_shape)
    if total == 0:
        return x  # nothing to copy; value-identical

    squeeze_back = False
    if x.ndim == 0:
        # Give the DMA a 1-D ref to slice/copy; negligible 1-element relayout.
        x = x.reshape(1)
        squeeze_back = True

    itemsize = jnp.dtype(x.dtype).itemsize
    bytes_total = total * itemsize
    leading = x.shape[0]

    # Chunk along the leading axis only (identical shapes/layouts on both
    # sides of every DMA; no wrapper reshape, no relayout, no padding).
    want_chunks = max(1, min(_MAX_CHUNKS, _cdiv(bytes_total, _TARGET_CHUNK_BYTES)))
    want_chunks = min(want_chunks, leading)
    chunk_rows = _cdiv(leading, want_chunks)
    n_chunks = _cdiv(leading, chunk_rows)

    kernel = _make_identity_dma_kernel(n_chunks, chunk_rows, leading)

    out = pl.pallas_call(
        kernel,
        out_shape=jax.ShapeDtypeStruct(x.shape, x.dtype),
        in_specs=[pl.BlockSpec(memory_space=pl.ANY)],
        out_specs=pl.BlockSpec(memory_space=pl.ANY),
        scratch_shapes=[pltpu.SemaphoreType.DMA((n_chunks,))],
        cost_estimate=pl.CostEstimate(
            flops=0, transcendentals=0, bytes_accessed=2 * bytes_total
        ),
    )(x)

    if squeeze_back:
        out = out.reshape(orig_shape)
    return out


def identity_pallas(x: jax.Array, *, materialize: bool = False) -> jax.Array:
    """Identity forward pass.

    Default (materialize=False): returns `x` unchanged -- exact nn.Identity
    semantics with zero HBM traffic (the dominant optimization for this module).
    materialize=True: produces a distinct output buffer via chunked HBM->HBM
    DMAs inside a Pallas kernel (no VMEM staging, no padding).
    """
    if not materialize:
        return x
    return _identity_copy_pallas(x)


if __name__ == "__main__":
    key = jax.random.PRNGKey(0)
    x = jax.random.normal(key, (2, 4, 16, 16), dtype=jnp.float32)

    # Fast path (recommended): true Identity, no copy at all.
    out_fast = identity_pallas(x)
    jax.block_until_ready(out_fast)
    assert out_fast.shape == x.shape and out_fast.dtype == x.dtype
    assert bool(jnp.all(out_fast == x)), "fast-path identity differs from input"

    # Materialized DMA-copy path (exercises the kernel).
    out_copy = identity_pallas(x, materialize=True)
    jax.block_until_ready(out_copy)
    assert out_copy.shape == x.shape and out_copy.dtype == x.dtype
    assert bool(jnp.all(out_copy == x)), "copy-kernel identity differs from input"

    # Awkward (non-128-divisible) shape: no padding / slicing needed anymore.
    x_odd = jax.random.normal(jax.random.PRNGKey(1), (3, 5, 7), dtype=jnp.float32)
    out_odd = identity_pallas(x_odd, materialize=True)
    jax.block_until_ready(out_odd)
    assert out_odd.shape == x_odd.shape and out_odd.dtype == x_odd.dtype
    assert bool(jnp.all(out_odd == x_odd)), "odd-shape identity differs from input"

    # bf16 coverage (no sublane/min-tile concerns with HBM->HBM DMA).
    x_bf16 = jax.random.normal(jax.random.PRNGKey(2), (4, 8, 32)).astype(jnp.bfloat16)
    out_bf16 = identity_pallas(x_bf16, materialize=True)
    jax.block_until_ready(out_bf16)
    assert out_bf16.shape == x_bf16.shape and out_bf16.dtype == x_bf16.dtype
    assert bool(jnp.all(out_bf16 == x_bf16)), "bf16 identity differs from input"

    # Larger f32 array: exercises the multi-chunk DMA path (8 chunks).
    x_big = jax.random.normal(jax.random.PRNGKey(3), (2048, 4096), dtype=jnp.float32)
    out_big = identity_pallas(x_big, materialize=True)
    jax.block_until_ready(out_big)
    assert bool(jnp.all(out_big == x_big)), "multi-chunk identity differs from input"

    print("KERNEL_OK")
</pallas_src>

<mosaic_0001>
module attributes {stable_mosaic.version = 11 : i64} {
  func.func @kernel(%arg0: memref<2x4x16x16xf32, #tpu.memory_space<any>>, %arg1: memref<2x4x16x16xf32, #tpu.memory_space<any>>, %arg2: memref<1x!tpu.dma_semaphore, #tpu.memory_space<semaphore_mem>>) attributes {dimension_semantics = [], scalar_prefetch = 0 : i64, scratch_operands = 1 : i64, tpu.core_type = #tpu.core_type<tc>} {
    %c0_i32 = arith.constant 0 : i32
    %0 = tpu.memref_slice %arg2[%c0_i32] : memref<1x!tpu.dma_semaphore, #tpu.memory_space<semaphore_mem>> -> memref<1x!tpu.dma_semaphore, #tpu.memory_space<semaphore_mem>>
    %1 = tpu.memref_squeeze %0 : memref<1x!tpu.dma_semaphore, #tpu.memory_space<semaphore_mem>> -> memref<!tpu.dma_semaphore, #tpu.memory_space<semaphore_mem>>
    tpu.enqueue_dma source(%arg0 : memref<2x4x16x16xf32, #tpu.memory_space<any>>) target(%arg1 : memref<2x4x16x16xf32, #tpu.memory_space<any>>) target_semaphore(%1 : memref<!tpu.dma_semaphore, #tpu.memory_space<semaphore_mem>>)
    %c0_i32_0 = arith.constant 0 : i32
    %2 = tpu.memref_slice %arg2[%c0_i32_0] : memref<1x!tpu.dma_semaphore, #tpu.memory_space<semaphore_mem>> -> memref<1x!tpu.dma_semaphore, #tpu.memory_space<semaphore_mem>>
    %3 = tpu.memref_squeeze %2 : memref<1x!tpu.dma_semaphore, #tpu.memory_space<semaphore_mem>> -> memref<!tpu.dma_semaphore, #tpu.memory_space<semaphore_mem>>
    tpu.wait_dma2 semaphore(%3 : memref<!tpu.dma_semaphore, #tpu.memory_space<semaphore_mem>>) src(%arg0 : memref<2x4x16x16xf32, #tpu.memory_space<any>>) dst(%arg1 : memref<2x4x16x16xf32, #tpu.memory_space<any>>)
    return
  }
}

</mosaic_0001>

<bundles_post_ra>
// kernel: tpu_custom_call.1
= control target key start
LH: loop header
LB: loop body
LE: loop exit
PB: predicated region body
PF: predicated region fallthrough
CT: control target
= control target key end

     0   :  { %s30_s6 = smov [#allocation2]   ;;  %s31_s7 = smov 131072   ;;  %s49_s0 = inlined_call_operand.hbm [shape: f32[2,4,16,16], index: 0, kind: input, shape index: {}]   ;;  %s50_s1 = inlined_call_operand.hbm [shape: f32[2,4,16,16], index: 1, kind: output, shape index: {}]  }
   0x1   :  { %s32_s8 = smov 0  }
   0x2   :  { %12 = dma.general %s49_s0, 2048, %s50_s1, %s30_s6, %s31_s7, [#allocation4], %s32_s8, 0  }
   0x3   :  { %28 = dma.done.wait [#allocation2], 2048 }
   0x4   :  { %29 = vsyncadd [#allocation2], 4294965248 }
   0x5   :  { %18 = vsyncmov [#allocation2] }
   0x8   :  { %s19_s13 = vpop.sfrf %18 }
   0x9   :  { %p24_p0 = scmp.ne.s32.totalorder %s19_s13, 0 }
   0xb   :  { %23 = shalt.err (%p24_p0)  }

</bundles_post_ra>
